<compile_context>
chip_gen: v6e
topology: v6e:2x2x1
jax: 0.10.0
libtpu: 0.0.40
codegen_flags: <defaults>
</compile_context>

<pallas_src>
import functools

import jax
import jax.numpy as jnp
from jax.experimental import pallas as pl
from jax.experimental.pallas import tpu as pltpu

PAD = 128  # lane-width padding for all feature dims


def _round_up(x, m):
    return ((x + m - 1) // m) * m


def mlp_kernel(x_ref, w1_ref, w2_ref, w3_ref, w4_ref, b_ref, o_ref):
    b = b_ref[...]                       # (4, PAD) f32, VMEM-resident
    h = x_ref[...]                       # (TB, PAD) f32

    # Layer 1: Linear + ReLU
    h = jnp.dot(h.astype(jnp.bfloat16), w1_ref[...],
                preferred_element_type=jnp.float32)
    h = jnp.maximum(h + b[0:1, :], 0.0)
    # Layer 2: Linear + ReLU
    h = jnp.dot(h.astype(jnp.bfloat16), w2_ref[...],
                preferred_element_type=jnp.float32)
    h = jnp.maximum(h + b[1:2, :], 0.0)
    # Layer 3: Linear + ReLU
    h = jnp.dot(h.astype(jnp.bfloat16), w3_ref[...],
                preferred_element_type=jnp.float32)
    h = jnp.maximum(h + b[2:3, :], 0.0)
    # Layer 4: Linear (no activation)
    h = jnp.dot(h.astype(jnp.bfloat16), w4_ref[...],
                preferred_element_type=jnp.float32)
    o_ref[...] = (h + b[3:4, :]).astype(o_ref.dtype)


@functools.partial(jax.jit, static_argnames=("input_dim",))
def simple_nn_forward(x, params, *, input_dim):
    """x: [batch, input_dim] f32. params: padded bf16 weights + packed f32 biases."""
    batch = x.shape[0]

    # Pad features to the 128-lane width (padded weight rows/cols are zero, so
    # the extra columns never affect the valid outputs).
    x_pad = jnp.zeros((batch, PAD), x.dtype).at[:, :input_dim].set(x)

    # Batch tile: large when the batch is large, otherwise the (8-aligned) batch.
    TB = 512 if batch >= 512 else _round_up(batch, 8)
    batch_pad = _round_up(batch, TB)
    if batch_pad != batch:
        x_pad = jnp.pad(x_pad, ((0, batch_pad - batch), (0, 0)))

    grid = (batch_pad // TB,)
    xo_spec = pl.BlockSpec((TB, PAD), lambda i: (i, 0))
    w_spec = pl.BlockSpec((PAD, PAD), lambda i: (0, 0))   # resident across steps
    b_spec = pl.BlockSpec((4, PAD), lambda i: (0, 0))     # resident across steps

    flops = 2 * batch_pad * PAD * PAD * 4
    bytes_accessed = (2 * batch_pad * PAD * 4              # x in + out
                      + 4 * PAD * PAD * 2 + 4 * PAD * 4)   # weights + biases

    out_pad = pl.pallas_call(
        mlp_kernel,
        out_shape=jax.ShapeDtypeStruct((batch_pad, PAD), jnp.float32),
        grid=grid,
        in_specs=[xo_spec, w_spec, w_spec, w_spec, w_spec, b_spec],
        out_specs=xo_spec,
        compiler_params=pltpu.CompilerParams(
            dimension_semantics=("parallel",)),
        cost_estimate=pl.CostEstimate(
            flops=flops, transcendentals=0, bytes_accessed=bytes_accessed),
    )(x_pad, params["w1"], params["w2"], params["w3"], params["w4"], params["b"])

    return out_pad[:batch, :input_dim]


def init_params(key, input_dim, hidden=64):
    """PyTorch-default-style init U(-1/sqrt(fan_in), 1/sqrt(fan_in)).

    Weights are stored transposed ([in, out]), zero-padded to (128, 128), bf16.
    Biases are packed into a single (4, 128) f32 buffer (zero-padded).
    """
    dims = [(input_dim, hidden), (hidden, hidden), (hidden, hidden), (hidden, input_dim)]
    params = {}
    biases = jnp.zeros((4, PAD), jnp.float32)
    for i, (fan_in, fan_out) in enumerate(dims, start=1):
        key, kw, kb = jax.random.split(key, 3)
        bound = 1.0 / jnp.sqrt(jnp.float32(fan_in))
        w = jax.random.uniform(kw, (fan_in, fan_out), jnp.float32,
                               minval=-bound, maxval=bound)
        b = jax.random.uniform(kb, (fan_out,), jnp.float32,
                               minval=-bound, maxval=bound)
        w_pad = jnp.zeros((PAD, PAD), jnp.float32).at[:fan_in, :fan_out].set(w)
        params[f"w{i}"] = w_pad.astype(jnp.bfloat16)
        biases = biases.at[i - 1, :fan_out].set(b)
    params["b"] = biases
    return params


def reference_forward(x, params, input_dim):
    """Pure-JAX reference mirroring the kernel's bf16-input / f32-accumulate math."""
    h = jnp.zeros((x.shape[0], PAD), jnp.float32).at[:, :input_dim].set(x)
    b = params["b"]
    for i in range(1, 5):
        w = params[f"w{i}"].astype(jnp.float32)
        h = jnp.dot(h.astype(jnp.bfloat16).astype(jnp.float32), w,
                    preferred_element_type=jnp.float32) + b[i - 1]
        if i < 4:
            h = jnp.maximum(h, 0.0)
    return h[:, :input_dim]


if __name__ == "__main__":
    key = jax.random.PRNGKey(0)
    batch, input_dim, hidden = 8, 32, 64

    kx, kp = jax.random.split(key)
    x = jax.random.normal(kx, (batch, input_dim), dtype=jnp.float32)
    params = init_params(kp, input_dim, hidden=hidden)

    out = simple_nn_forward(x, params, input_dim=input_dim)
    out = jax.block_until_ready(out)

    ref = reference_forward(x, params, input_dim)
    assert out.shape == (batch, input_dim)
    assert jnp.allclose(out, ref, atol=1e-2, rtol=1e-2), float(jnp.max(jnp.abs(out - ref)))
    print("KERNEL_OK")
</pallas_src>

<mosaic_0001>
module attributes {stable_mosaic.version = 11 : i64} {
  func.func @mlp_kernel(%arg0: i32, %arg1: memref<8x128xf32, #tpu.memory_space<vmem>>, %arg2: memref<128x128xbf16, #tpu.memory_space<vmem>>, %arg3: memref<128x128xbf16, #tpu.memory_space<vmem>>, %arg4: memref<128x128xbf16, #tpu.memory_space<vmem>>, %arg5: memref<128x128xbf16, #tpu.memory_space<vmem>>, %arg6: memref<4x128xf32, #tpu.memory_space<vmem>>, %arg7: memref<8x128xf32, #tpu.memory_space<vmem>>) attributes {dimension_semantics = [#tpu.dimension_semantics<parallel>], iteration_bounds = array<i64: 1>, scalar_prefetch = 0 : i64, scratch_operands = 0 : i64, tpu.core_type = #tpu.core_type<tc>, window_params = [{transform_indices = @transform_0, window_bounds = array<i64: 8, 128>}, {pipeline_mode = #tpu.pipeline_mode<synchronous>, transform_indices = @transform_1, window_bounds = array<i64: 128, 128>}, {pipeline_mode = #tpu.pipeline_mode<synchronous>, transform_indices = @transform_2, window_bounds = array<i64: 128, 128>}, {pipeline_mode = #tpu.pipeline_mode<synchronous>, transform_indices = @transform_3, window_bounds = array<i64: 128, 128>}, {pipeline_mode = #tpu.pipeline_mode<synchronous>, transform_indices = @transform_4, window_bounds = array<i64: 128, 128>}, {pipeline_mode = #tpu.pipeline_mode<synchronous>, transform_indices = @transform_5, window_bounds = array<i64: 4, 128>}, {transform_indices = @transform_6, window_bounds = array<i64: 8, 128>}]} {
    %c0 = arith.constant 0 : index
    %c0_0 = arith.constant 0 : index
    %0 = vector.load %arg6[%c0, %c0_0] : memref<4x128xf32, #tpu.memory_space<vmem>>, vector<4x128xf32>
    %c0_1 = arith.constant 0 : index
    %c0_2 = arith.constant 0 : index
    %1 = vector.load %arg1[%c0_1, %c0_2] : memref<8x128xf32, #tpu.memory_space<vmem>>, vector<8x128xf32>
    %2 = arith.truncf %1 : vector<8x128xf32> to vector<8x128xbf16>
    %c0_3 = arith.constant 0 : index
    %c0_4 = arith.constant 0 : index
    %3 = vector.load %arg2[%c0_3, %c0_4] : memref<128x128xbf16, #tpu.memory_space<vmem>>, vector<128x128xbf16>
    %cst = arith.constant dense<0.000000e+00> : vector<8x128xf32>
    %4 = tpu.matmul %2, %3, %cst {dimension_numbers = #tpu.dot_dimension_numbers<[1], [0], [0], [1], [0, 0, 1, 1], [], []>} : vector<8x128xbf16>, vector<128x128xbf16>, vector<8x128xf32> -> vector<8x128xf32>
    %5 = vector.extract_strided_slice %0 {offsets = [0, 0], sizes = [1, 128], strides = [1, 1]} : vector<4x128xf32> to vector<1x128xf32>
    %6 = vector.broadcast %5 : vector<1x128xf32> to vector<8x128xf32>
    %7 = arith.addf %4, %6 : vector<8x128xf32>
    %cst_5 = arith.constant 0.000000e+00 : f32
    %8 = vector.broadcast %cst_5 : f32 to vector<8x128xf32>
    %9 = arith.maximumf %7, %8 : vector<8x128xf32>
    %10 = arith.truncf %9 : vector<8x128xf32> to vector<8x128xbf16>
    %c0_6 = arith.constant 0 : index
    %c0_7 = arith.constant 0 : index
    %11 = vector.load %arg3[%c0_6, %c0_7] : memref<128x128xbf16, #tpu.memory_space<vmem>>, vector<128x128xbf16>
    %cst_8 = arith.constant dense<0.000000e+00> : vector<8x128xf32>
    %12 = tpu.matmul %10, %11, %cst_8 {dimension_numbers = #tpu.dot_dimension_numbers<[1], [0], [0], [1], [0, 0, 1, 1], [], []>} : vector<8x128xbf16>, vector<128x128xbf16>, vector<8x128xf32> -> vector<8x128xf32>
    %13 = vector.extract_strided_slice %0 {offsets = [1, 0], sizes = [1, 128], strides = [1, 1]} : vector<4x128xf32> to vector<1x128xf32>
    %14 = vector.broadcast %13 : vector<1x128xf32> to vector<8x128xf32>
    %15 = arith.addf %12, %14 : vector<8x128xf32>
    %cst_9 = arith.constant 0.000000e+00 : f32
    %16 = vector.broadcast %cst_9 : f32 to vector<8x128xf32>
    %17 = arith.maximumf %15, %16 : vector<8x128xf32>
    %18 = arith.truncf %17 : vector<8x128xf32> to vector<8x128xbf16>
    %c0_10 = arith.constant 0 : index
    %c0_11 = arith.constant 0 : index
    %19 = vector.load %arg4[%c0_10, %c0_11] : memref<128x128xbf16, #tpu.memory_space<vmem>>, vector<128x128xbf16>
    %cst_12 = arith.constant dense<0.000000e+00> : vector<8x128xf32>
    %20 = tpu.matmul %18, %19, %cst_12 {dimension_numbers = #tpu.dot_dimension_numbers<[1], [0], [0], [1], [0, 0, 1, 1], [], []>} : vector<8x128xbf16>, vector<128x128xbf16>, vector<8x128xf32> -> vector<8x128xf32>
    %21 = vector.extract_strided_slice %0 {offsets = [2, 0], sizes = [1, 128], strides = [1, 1]} : vector<4x128xf32> to vector<1x128xf32>
    %22 = vector.broadcast %21 : vector<1x128xf32> to vector<8x128xf32>
    %23 = arith.addf %20, %22 : vector<8x128xf32>
    %cst_13 = arith.constant 0.000000e+00 : f32
    %24 = vector.broadcast %cst_13 : f32 to vector<8x128xf32>
    %25 = arith.maximumf %23, %24 : vector<8x128xf32>
    %26 = arith.truncf %25 : vector<8x128xf32> to vector<8x128xbf16>
    %c0_14 = arith.constant 0 : index
    %c0_15 = arith.constant 0 : index
    %27 = vector.load %arg5[%c0_14, %c0_15] : memref<128x128xbf16, #tpu.memory_space<vmem>>, vector<128x128xbf16>
    %cst_16 = arith.constant dense<0.000000e+00> : vector<8x128xf32>
    %28 = tpu.matmul %26, %27, %cst_16 {dimension_numbers = #tpu.dot_dimension_numbers<[1], [0], [0], [1], [0, 0, 1, 1], [], []>} : vector<8x128xbf16>, vector<128x128xbf16>, vector<8x128xf32> -> vector<8x128xf32>
    %29 = vector.extract_strided_slice %0 {offsets = [3, 0], sizes = [1, 128], strides = [1, 1]} : vector<4x128xf32> to vector<1x128xf32>
    %30 = vector.broadcast %29 : vector<1x128xf32> to vector<8x128xf32>
    %31 = arith.addf %28, %30 : vector<8x128xf32>
    %c0_17 = arith.constant 0 : index
    %c0_18 = arith.constant 0 : index
    %32 = vector.load %arg7[%c0_17, %c0_18] : memref<8x128xf32, #tpu.memory_space<vmem>>, vector<8x128xf32>
    tpu.vector_store %arg7[%c0_17, %c0_18], %31 {strides = array<i32>} : memref<8x128xf32, #tpu.memory_space<vmem>>, vector<8x128xf32>,
    return
  }
  func.func @transform_0(%arg0: i32) -> (i32, i32) {
    %c0_i32 = arith.constant 0 : i32
    %c0_i32_0 = arith.constant 0 : i32
    return %arg0, %c0_i32 : i32, i32
  }
  func.func @transform_1(%arg0: i32) -> (i32, i32) {
    %c0_i32 = arith.constant 0 : i32
    %c0_i32_0 = arith.constant 0 : i32
    %c0_i32_1 = arith.constant 0 : i32
    return %c0_i32, %c0_i32_0 : i32, i32
  }
  func.func @transform_2(%arg0: i32) -> (i32, i32) {
    %c0_i32 = arith.constant 0 : i32
    %c0_i32_0 = arith.constant 0 : i32
    %c0_i32_1 = arith.constant 0 : i32
    return %c0_i32, %c0_i32_0 : i32, i32
  }
  func.func @transform_3(%arg0: i32) -> (i32, i32) {
    %c0_i32 = arith.constant 0 : i32
    %c0_i32_0 = arith.constant 0 : i32
    %c0_i32_1 = arith.constant 0 : i32
    return %c0_i32, %c0_i32_0 : i32, i32
  }
  func.func @transform_4(%arg0: i32) -> (i32, i32) {
    %c0_i32 = arith.constant 0 : i32
    %c0_i32_0 = arith.constant 0 : i32
    %c0_i32_1 = arith.constant 0 : i32
    return %c0_i32, %c0_i32_0 : i32, i32
  }
  func.func @transform_5(%arg0: i32) -> (i32, i32) {
    %c0_i32 = arith.constant 0 : i32
    %c0_i32_0 = arith.constant 0 : i32
    %c0_i32_1 = arith.constant 0 : i32
    return %c0_i32, %c0_i32_0 : i32, i32
  }
  func.func @transform_6(%arg0: i32) -> (i32, i32) {
    %c0_i32 = arith.constant 0 : i32
    %c0_i32_0 = arith.constant 0 : i32
    return %arg0, %c0_i32 : i32, i32
  }
}

</mosaic_0001>

<bundles_post_ra>
// kernel: simple_nn_forward.1
= control target key start
LH: loop header
LB: loop body
LE: loop exit
PB: predicated region body
PF: predicated region fallthrough
CT: control target
= control target key end

     0   :  { %11 = vsyncpa [#allocation3], 0  ;;  %s959_s0 = inlined_call_operand.vmem [shape: f32[8,128], index: 0, kind: input, shape index: {}]   ;;  %s960_s1 = inlined_call_operand.hbm [shape: bf16[128,128], index: 1, kind: input, shape index: {}]   ;;  %s961_s2 = inlined_call_operand.hbm [shape: bf16[128,128], index: 2, kind: input, shape index: {}]   ;;  %s962_s3 = inlined_call_operand.hbm [shape: bf16[128,128], index: 3, kind: input, shape index: {}]   ;;  %s963_s4 = inlined_call_operand.hbm [shape: bf16[128,128], index: 4, kind: input, shape index: {}]   ;;  %s964_s5 = inlined_call_operand.vmem [shape: f32[4,128], index: 5, kind: input, shape index: {}]   ;;  %s965_s6 = inlined_call_operand.hbm [shape: f32[8,128], index: 6, kind: output, shape index: {}]  }
   0x1   :  { %12 = vsyncpa [#allocation6], 0 }
   0x2   :  { %13 = vsyncpa [#allocation9], 0 }
   0x3   :  { %14 = vsyncpa [#allocation4], 0  ;;  %s836_s21 = smov [#allocation5]   ;;  %s837_s23 = smov [#allocation2]  }
   0x4   :  { %s34_s22 = sshll.u32 %s836_s21, 4  ;;  %s22_s24 = sshll.u32 %s837_s23, 4  ;;  %s35_s22 = int_to_ptr.vmem [resolvable:$true] %s34_s22  ;;  %s23_s24 = int_to_ptr.vmem [resolvable:$true] %s22_s24 }
   0x5   :  { %s736_s25 = scalar_lea.vmem %s35_s22, 1024  ;;  %p741_p1 = scmp.lt.s32.totalorder %s35_s22, %s35_s22 }
   0x6   :  { %p737_p0 = scmp.ne.s32.totalorder %s35_s22, %s736_s25  ;;  %p742_p2 = scmp.lt.s32.totalorder %s736_s25, %s736_s25 }
   0x8   :  { %p743_p3 = por %p742_p2, %p741_p1 }
   0xa   :  { %p744_p4 = pnand %p743_p3, %p737_p0 }
   0xc   :  { %747 = shalt.err (!%p744_p4)
}
   0xd   :  { %s838_s26 = smov 64   ;;  %s839_s27 = smov 4  }
   0xe   :  { %40 = dma.hbm_to_vmem [thread:$0]  %s961_s2, 1024, %s35_s22, [#allocation6], %s838_s26, %s838_s26, %s839_s27  }
   0xf   :  { %s756_s30 = scalar_lea.vmem %s23_s24, 1024  ;;  %p761_p6 = scmp.lt.s32.totalorder %s23_s24, %s23_s24 }
  0x10   :  { %p757_p5 = scmp.ne.s32.totalorder %s23_s24, %s756_s30  ;;  %p762_p7 = scmp.lt.s32.totalorder %s756_s30, %s756_s30 }
  0x12   :  { %p763_p8 = por %p762_p7, %p761_p6 }
  0x14   :  { %p764_p9 = pnand %p763_p8, %p757_p5 }
  0x16   :  { %767 = shalt.err (!%p764_p9)
}
  0x17   :  { %28 = dma.hbm_to_vmem [thread:$0]  %s960_s1, 1024, %s23_s24, [#allocation3], %s838_s26, %s838_s26, %s839_s27  }
  0x18   :  { %s840_s9 = smov [#allocation7]   ;;  %s841_s11 = smov [#allocation8]  }
  0x19   :  { %s46_s10 = sshll.u32 %s840_s9, 4  ;;  %s58_s12 = sshll.u32 %s841_s11, 4  ;;  %s47_s10 = int_to_ptr.vmem [resolvable:$true] %s46_s10  ;;  %s59_s12 = int_to_ptr.vmem [resolvable:$true] %s58_s12 }
  0x1a   :  { %s776_s2 = scalar_lea.vmem %s47_s10, 1024  ;;  %p781_p11 = scmp.lt.s32.totalorder %s47_s10, %s47_s10 }
  0x1b   :  { %p777_p10 = scmp.ne.s32.totalorder %s47_s10, %s776_s2  ;;  %p782_p12 = scmp.lt.s32.totalorder %s776_s2, %s776_s2 }
  0x1d   :  { %p783_p13 = por %p782_p12, %p781_p11 }
  0x1f   :  { %p784_p0 = pnand %p783_p13, %p777_p10 }
  0x21   :  { %787 = shalt.err (!%p784_p0)
}
  0x22   :  { %52 = dma.hbm_to_vmem [thread:$0]  %s962_s3, 1024, %s47_s10, [#allocation6], %s838_s26, %s838_s26, %s839_s27  }
  0x23   :  { %s796_s1 = scalar_lea.vmem %s59_s12, 1024  ;;  %p801_p2 = scmp.lt.s32.totalorder %s59_s12, %s59_s12 }
  0x24   :  { %p797_p1 = scmp.ne.s32.totalorder %s59_s12, %s796_s1  ;;  %p802_p3 = scmp.lt.s32.totalorder %s796_s1, %s796_s1 }
  0x26   :  { %p803_p4 = por %p802_p3, %p801_p2 }
  0x28   :  { %p804_p5 = pnand %p803_p4, %p797_p1 }
  0x2a   :  { %807 = shalt.err (!%p804_p5)
}
  0x2b   :  { %64 = dma.hbm_to_vmem [thread:$0]  %s963_s4, 1024, %s59_s12, [#allocation9], %s838_s26, %s838_s26, %s839_s27  }
  0x2c   :  { %828 = dma.done.wait [#allocation3], 1024  }
  0x2d   :  { %829 = vsyncadd [#allocation3], 4294966272 }
  0x2e   :  { %830 = dma.done.wait [#allocation6], 2048  }
  0x2f   :  { %831 = vsyncadd [#allocation6], 4294965248 }
  0x30   :  { %832 = dma.done.wait [#allocation9], 1024  }
  0x31   :  { %833 = vsyncadd [#allocation9], 4294966272  ;;  %v842_v0 = vmov 0.0   ;;  %vm843_vm0 = vmmov 0   ;;  %v696_v1 = vld [vmem:[#allocation2 + $0x38] sm:$0xff]   ;;  %v697_v2 = vld [vmem:[#allocation2 + $0x30] sm:$0xff]   ;;  %v99_v25 = vlaneseq }
  0x32   :  { %607 = vmatprep.subr.bf16.mxu0 %v842_v0  ;;  %623 = vmatprep.mubr.msk.bf16.mxu0 %vm843_vm0, %v842_v0  ;;  %v698_v3 = vld [vmem:[#allocation2 + $0x28] sm:$0xff]   ;;  %v704_v4 = vld [vmem:[#allocation5 + $0x38] sm:$0xff]   ;;  %v699_v5 = vld [vmem:[#allocation2 + $0x20] sm:$0xff]  }
  0x33   :  { %627 = vmatprep.subr.bf16.mxu1 %v842_v0  ;;  %643 = vmatprep.mubr.msk.bf16.mxu1 %vm843_vm0, %v842_v0  ;;  %v705_v6 = vld [vmem:[#allocation5 + $0x30] sm:$0xff]   ;;  %v700_v7 = vld [vmem:[#allocation2 + $0x18] sm:$0xff]   ;;  %v706_v8 = vld [vmem:[#allocation5 + $0x28] sm:$0xff]   ;;  %v937_v26 = vshrl.u32 %v99_v25, 7 }
  0x34   :  { %608 = vmatpush3.bf16.msra.mxu0 %v696_v1  ;;  %628 = vmatpush3.bf16.msra.mxu1 %v704_v4  ;;  %v701_v9 = vld [vmem:[#allocation2 + $0x10] sm:$0xff]   ;;  %v707_v10 = vld [vmem:[#allocation5 + $0x20] sm:$0xff]   ;;  %v702_v11 = vld [vmem:[#allocation2 + $0x8] sm:$0xff]  }
  0x35   :  { %609 = vmatprep.subr.bf16.mxu0 %v842_v0  ;;  %629 = vmatprep.subr.bf16.mxu1 %v842_v0  ;;  %v708_v12 = vld [vmem:[#allocation5 + $0x18] sm:$0xff]   ;;  %v703_v13 = vld [vmem:[#allocation2] sm:$0xff]   ;;  %v709_v15 = vld [vmem:[#allocation5 + $0x10] sm:$0xff]   ;;  %v101_v27 = vsub.s32 0, %v937_v26  ;;  %v211_v45 = vsub.s32 1, %v937_v26  ;;  %v321_v56 = vsub.s32 2, %v937_v26 }
  0x36   :  { %v81_v14 = vld [vmem:[%s959_s0] sm:$0xff]  ;;  %v710_v17 = vld [vmem:[#allocation5 + $0x8] sm:$0xff]   ;;  %v712_v19 = vld [vmem:[#allocation7 + $0x38] sm:$0xff]  }
  0x37   :  { %v82_v16 = vpack.c.bf16 %v81_v14, %v81_v14  ;;  %v711_v18 = vld [vmem:[#allocation5] sm:$0xff]   ;;  %v713_v20 = vld [vmem:[#allocation7 + $0x30] sm:$0xff]   ;;  %v714_v21 = vld [vmem:[#allocation7 + $0x28] sm:$0xff]  }
  0x38   :  { %610 = vmatpush3.bf16.msra.mxu0 %v697_v2  ;;  %630 = vmatpush3.bf16.msra.mxu1 %v705_v6  ;;  %v715_v22 = vld [vmem:[#allocation7 + $0x20] sm:$0xff]   ;;  %v716_v23 = vld [vmem:[#allocation7 + $0x18] sm:$0xff]   ;;  %v717_v24 = vld [vmem:[#allocation7 + $0x10] sm:$0xff]   ;;  %v431_v2 = vsub.s32 3, %v937_v26 }
  0x39   :  { %611 = vmatprep.subr.bf16.mxu0 %v842_v0  ;;  %631 = vmatprep.subr.bf16.mxu1 %v842_v0  ;;  %v80_v28 = vld [vmem:[%s964_s5] sm:$0xf]  ;;  %v718_v37 = vld [vmem:[#allocation7 + $0x8] sm:$0xff]   ;;  %v720_v39 = vld [vmem:[#allocation8 + $0x38] sm:$0xff]   ;;  %s844_s5 = smov [#allocation10]  }
  0x3a   :  { %v102_v29 = vrot.slane %v80_v28, %v101_v27  ;;  %v719_v38 = vld [vmem:[#allocation7] sm:$0xff]   ;;  %v721_v40 = vld [vmem:[#allocation8 + $0x30] sm:$0xff]   ;;  %v722_v41 = vld [vmem:[#allocation8 + $0x28] sm:$0xff]   ;;  %v212_v46 = vrot.slane %v80_v28, %v211_v45  ;;  %v322_v57 = vrot.slane %v80_v28, %v321_v56  ;;  %s528_s18 = sshll.u32 %s844_s5, 4  ;;  %s529_s18 = int_to_ptr.vmem [resolvable:$true] %s528_s18 }
  0x3b   :  { %v723_v42 = vld [vmem:[#allocation8 + $0x20] sm:$0xff]   ;;  %v724_v43 = vld [vmem:[#allocation8 + $0x18] sm:$0xff]   ;;  %v725_v44 = vld [vmem:[#allocation8 + $0x10] sm:$0xff]   ;;  %s808_s19 = scalar_lea.vmem %s529_s18, 128  ;;  %p813_p7 = scmp.lt.s32.totalorder %s529_s18, %s529_s18 }
  0x3c   :  { %612 = vmatpush3.bf16.msra.mxu0 %v698_v3  ;;  %632 = vmatpush3.bf16.msra.mxu1 %v706_v8  ;;  %v726_v54 = vld [vmem:[#allocation8 + $0x8] sm:$0xff]   ;;  %v727_v55 = vld [vmem:[#allocation8] sm:$0xff]   ;;  %v432_v3 = vrot.slane %v80_v28, %v431_v2  ;;  %p809_p6 = scmp.ne.s32.totalorder %s529_s18, %s808_s19  ;;  %p814_p8 = scmp.lt.s32.totalorder %s808_s19, %s808_s19 }
  0x3d   :  { %613 = vmatprep.subr.bf16.mxu0 %v842_v0  ;;  %633 = vmatprep.subr.bf16.mxu1 %v842_v0 }
  0x3e   :  { %p815_p9 = por %p814_p8, %p813_p7 }
  0x40   :  { %614 = vmatpush3.bf16.msra.mxu0 %v699_v5  ;;  %634 = vmatpush3.bf16.msra.mxu1 %v707_v10  ;;  %p816_p10 = pnand %p815_p9, %p809_p6 }
  0x41   :  { %615 = vmatprep.subr.bf16.mxu0 %v842_v0  ;;  %635 = vmatprep.subr.bf16.mxu1 %v842_v0 }
  0x44   :  { %616 = vmatpush3.bf16.msra.mxu0 %v700_v7  ;;  %636 = vmatpush3.bf16.msra.mxu1 %v708_v12 }
  0x45   :  { %617 = vmatprep.subr.bf16.mxu0 %v842_v0  ;;  %637 = vmatprep.subr.bf16.mxu1 %v842_v0 }
  0x48   :  { %618 = vmatpush3.bf16.msra.mxu0 %v701_v9  ;;  %638 = vmatpush3.bf16.msra.mxu1 %v709_v15 }
  0x49   :  { %619 = vmatprep.subr.bf16.mxu0 %v842_v0  ;;  %639 = vmatprep.subr.bf16.mxu1 %v842_v0 }
  0x4c   :  { %620 = vmatpush3.bf16.msra.mxu0 %v702_v11  ;;  %640 = vmatpush3.bf16.msra.mxu1 %v710_v17 }
  0x4d   :  { %621 = vmatprep.subr.bf16.mxu0 %v842_v0  ;;  %641 = vmatprep.subr.bf16.mxu1 %v842_v0 }
  0x50   :  { %622 = vmatpush3.bf16.msra.mxu0 %v703_v13  ;;  %642 = vmatpush3.bf16.msra.mxu1 %v711_v18 }
  0x51   :  { %647 = vmatprep.subr.bf16.mxu0 %v842_v0  ;;  %667 = vmatprep.subr.bf16.mxu1 %v842_v0 }
  0x53   :  { %624 = vmatmul.mubr.bf16.vlgmr.msra.gmra.mxu0 %v82_v16 }
  0x54   :  { %663 = vmatprep.mubr.msk.bf16.mxu0 %vm843_vm0, %v842_v0  ;;  %648 = vmatpush3.bf16.msra.mxu0 %v712_v19 }
  0x55   :  { %649 = vmatprep.subr.bf16.mxu0 %v842_v0 }
  0x58   :  { %650 = vmatpush3.bf16.msra.mxu0 %v713_v20 }
  0x59   :  { %651 = vmatprep.subr.bf16.mxu0 %v842_v0 }
  0x5c   :  { %652 = vmatpush3.bf16.msra.mxu0 %v714_v21 }
  0x5d   :  { %653 = vmatprep.subr.bf16.mxu0 %v842_v0 }
  0x60   :  { %654 = vmatpush3.bf16.msra.mxu0 %v715_v22 }
  0x61   :  { %655 = vmatprep.subr.bf16.mxu0 %v842_v0 }
  0x64   :  { %656 = vmatpush3.bf16.msra.mxu0 %v716_v23 }
  0x65   :  { %657 = vmatprep.subr.bf16.mxu0 %v842_v0 }
  0x68   :  { %658 = vmatpush3.bf16.msra.mxu0 %v717_v24 }
  0x69   :  { %659 = vmatprep.subr.bf16.mxu0 %v842_v0 }
  0x6c   :  { %660 = vmatpush3.bf16.msra.mxu0 %v718_v37 }
  0x6d   :  { %661 = vmatprep.subr.bf16.mxu0 %v842_v0 }
  0x70   :  { %662 = vmatpush3.bf16.msra.mxu0 %v719_v38 }
 0x113   :  { %v185_v30 = vpop.f32.mrf.mxu0 }
 0x114   :  { %v186_v31 = vadd.f32 %v185_v30, %v102_v29 }
 0x115   :  { %v625_v32 = vpop.f32.mrf.mxu0 }
 0x116   :  { %v191_v33 = vmax.f32 %v186_v31, 0.0 }
 0x117   :  { %v188_v34 = vpop.f32.mrf.mxu0 }
 0x118   :  { %v192_v35 = vpack.c.bf16 %v191_v33, %v191_v33 }
 0x119   :  { %v626_v36 = vpop.f32.mrf.mxu0 }
 0x11a   :  { %644 = vmatmul.mubr.bf16.vlgmr.msra.gmra.mxu1 %v192_v35 }
 0x11b   :  { %683 = vmatprep.mubr.msk.bf16.mxu1 %vm843_vm0, %v842_v0  ;;  %668 = vmatpush3.bf16.msra.mxu1 %v720_v39 }
 0x11c   :  { %669 = vmatprep.subr.bf16.mxu1 %v842_v0 }
 0x11f   :  { %670 = vmatpush3.bf16.msra.mxu1 %v721_v40 }
 0x120   :  { %671 = vmatprep.subr.bf16.mxu1 %v842_v0 }
 0x123   :  { %672 = vmatpush3.bf16.msra.mxu1 %v722_v41 }
 0x124   :  { %673 = vmatprep.subr.bf16.mxu1 %v842_v0 }
 0x127   :  { %674 = vmatpush3.bf16.msra.mxu1 %v723_v42 }
 0x128   :  { %675 = vmatprep.subr.bf16.mxu1 %v842_v0 }
 0x12b   :  { %676 = vmatpush3.bf16.msra.mxu1 %v724_v43 }
 0x12c   :  { %677 = vmatprep.subr.bf16.mxu1 %v842_v0 }
 0x12f   :  { %678 = vmatpush3.bf16.msra.mxu1 %v725_v44 }
 0x130   :  { %679 = vmatprep.subr.bf16.mxu1 %v842_v0 }
 0x133   :  { %680 = vmatpush3.bf16.msra.mxu1 %v726_v54 }
 0x134   :  { %681 = vmatprep.subr.bf16.mxu1 %v842_v0 }
 0x137   :  { %682 = vmatpush3.bf16.msra.mxu1 %v727_v55 }
 0x1da   :  { %v295_v47 = vpop.f32.mrf.mxu1 }
 0x1db   :  { %v296_v48 = vadd.f32 %v295_v47, %v212_v46 }
 0x1dc   :  { %v645_v49 = vpop.f32.mrf.mxu1 }
 0x1dd   :  { %v301_v50 = vmax.f32 %v296_v48, 0.0 }
 0x1de   :  { %v298_v51 = vpop.f32.mrf.mxu1 }
 0x1df   :  { %v302_v52 = vpack.c.bf16 %v301_v50, %v301_v50 }
 0x1e0   :  { %v646_v53 = vpop.f32.mrf.mxu1 }
 0x1e1   :  { %664 = vmatmul.mubr.bf16.vlgmr.msra.gmra.mxu0 %v302_v52 }
 0x2a1   :  { %v405_v58 = vpop.f32.mrf.mxu0 }
 0x2a2   :  { %v406_v59 = vadd.f32 %v405_v58, %v322_v57 }
 0x2a3   :  { %v665_v60 = vpop.f32.mrf.mxu0 }
 0x2a4   :  { %v411_v61 = vmax.f32 %v406_v59, 0.0 }
 0x2a5   :  { %v408_v62 = vpop.f32.mrf.mxu0 }
 0x2a6   :  { %v412_v63 = vpack.c.bf16 %v411_v61, %v411_v61 }
 0x2a7   :  { %v666_v1 = vpop.f32.mrf.mxu0 }
 0x2a8   :  { %684 = vmatmul.mubr.bf16.vlgmr.msra.gmra.mxu1 %v412_v63 }
 0x368   :  { %v515_v4 = vpop.f32.mrf.mxu1 }
 0x369   :  { %v516_v0 = vadd.f32 %v515_v4, %v432_v3 }
 0x36a   :  { %v685_v5 = vpop.f32.mrf.mxu1 }
 0x36b   :  { %521 = vst [vmem:[#allocation10] sm:$0xff] %v516_v0 }
 0x36c   :  { %v518_v6 = vpop.f32.mrf.mxu1 }
 0x36d   :  { %819 = shalt.err (!%p816_p10)
}
 0x36e   :  { %531 = dma.vmem_to_hbm [thread:$0]  %s529_s18, 128, %s965_s6, [#allocation4]   ;;  %v686_v7 = vpop.f32.mrf.mxu1 }
 0x36f   :  { %834 = dma.done.wait [#allocation4], 128  }
 0x370   :  { %835 = vsyncadd [#allocation4], 4294967168 }
 0x371   :  { %535 = vsyncpa [#allocation3], 1 }
 0x372   :  { %536 = vsyncpa [#allocation6], 1 }
 0x373   :  { %537 = vsyncpa [#allocation9], 1 }
 0x374   :  { %538 = vsyncpa [#allocation4], 1 }

</bundles_post_ra>
